<compile_context>
chip_gen: v5e
topology: v5e:2x2
jax: 0.10.0
libtpu: 0.0.40
codegen_flags: <defaults>
</compile_context>

<pallas_src>
import functools

import jax
import jax.numpy as jnp
from jax.experimental import pallas as pl
from jax.experimental.pallas import tpu as pltpu


def _cdiv(a: int, b: int) -> int:
    return -(-a // b)


def _round_up(a: int, m: int) -> int:
    return _cdiv(a, m) * m


def _amp_modify_kernel(x_ref, o_ref, *, f):
    # Pure HBM-streaming kernel: the VPU is ~idle, so the f32 upcast / multiply /
    # downcast are free.  f32 math matches the float32 PyTorch reference and keeps
    # bf16 / f16 / integer inputs well-defined.
    o_ref[...] = (x_ref[...].astype(jnp.float32) * f).astype(o_ref.dtype)


def _vmem_capacity_bytes() -> int:
    try:
        cap = getattr(pltpu.get_tpu_info(), "vmem_capacity_bytes", None)
        if cap:
            return int(cap)
    except Exception:
        pass
    return 64 * 1024 * 1024  # conservative default (v7x per-TC VMEM)


def _scale_2d(x2d, f, out_dtype, block_bytes, sub, vmem_limit, alias_in_out):
    R, C = x2d.shape
    itemsize = jnp.dtype(x2d.dtype).itemsize
    total_bytes = R * C * itemsize

    # Column block: full extent when it fits the budget alongside `sub` rows,
    # otherwise a lane-dense multiple of 128 (Pallas masks the edge tiles).
    max_cols = max(128, (block_bytes // (sub * itemsize)) // 128 * 128)
    bc = C if C <= max_cols else max_cols

    # Row block from the remaining per-block byte budget, rounded to the
    # dtype-native sublane multiple (8 f32, 16 bf16/f16, 32 int8/fp8).
    row_budget = max(1, block_bytes // (bc * itemsize))
    br = R if row_budget >= R else max(sub, (row_budget // sub) * sub)

    # Guarantee >=4 grid steps for inputs above ~1 MiB so the read/write DMA
    # streams overlap and both v7x TensorCores get work.
    if total_bytes > (1 << 20):
        while _cdiv(R, br) * _cdiv(C, bc) < 4 and (br > sub or bc > 128):
            if br > sub:
                br = max(sub, _round_up(_cdiv(br, 2), sub))
            else:
                bc = max(128, _round_up(_cdiv(bc, 2), 128))

    grid = (pl.cdiv(R, br), pl.cdiv(C, bc))
    return pl.pallas_call(
        functools.partial(_amp_modify_kernel, f=float(f)),
        out_shape=jax.ShapeDtypeStruct((R, C), out_dtype),
        grid_spec=pl.GridSpec(
            grid=grid,
            in_specs=[pl.BlockSpec((br, bc), lambda i, j: (i, j))],
            out_specs=pl.BlockSpec((br, bc), lambda i, j: (i, j)),
        ),
        compiler_params=pltpu.CompilerParams(
            dimension_semantics=("parallel", "parallel"),
            vmem_limit_bytes=vmem_limit,
        ),
        input_output_aliases={0: 0} if alias_in_out else {},
    )(x2d)


def amplitude_modify(audio: jax.Array, f: float, *, donate_input: bool = False) -> jax.Array:
    """AmplitudeModify.forward: returns audio * f (any shape; float / int dtypes)."""
    orig_shape = audio.shape
    in_dtype = audio.dtype
    # PyTorch promotion: floating tensor * python float keeps the tensor dtype;
    # integer tensors promote to float32.
    out_dtype = in_dtype if jnp.issubdtype(in_dtype, jnp.floating) else jnp.float32

    n = audio.size
    if n == 0 or audio.ndim == 0:
        return (audio.astype(jnp.float32) * float(f)).astype(out_dtype)

    itemsize = jnp.dtype(in_dtype).itemsize
    sub = max(8, 32 // itemsize)  # dtype-native sublane multiple

    vmem_cap = _vmem_capacity_bytes()
    # 4 live buffers (in + out, double-buffered) -> <= vmem/8 per block, capped at
    # 8 MiB (per-grid-step overhead already <2% of block DMA time there on any
    # generation: v7x ~2.5us/step, v6e ~5.7us, v5e ~10us vs ~0.35us overhead).
    block_bytes = min(max(vmem_cap // 8, 2 << 20), 8 << 20)
    vmem_limit = min(3 * vmem_cap // 4, 64 << 20)  # ~48 MiB on v7x, 64 MiB on v5e/v6e

    # Lane-dense slab selection.  A contiguous flatten+reshape is free, so when the
    # element count divides 1024 (or 128) run on a wide (rows, width) slab with
    # fully unmasked (8,128)-aligned stores.  Ragged totals (n % 128 != 0) run
    # directly on (prod(leading), last) and let Pallas mask the edge tiles — no
    # jnp.pad of the input and no [:n] slice of the output.
    if n % 1024 == 0:
        x2d = audio.reshape(n // 1024, 1024)
    elif n % 128 == 0:
        x2d = audio.reshape(n // 128, 128)
    else:
        lead = 1
        for d in orig_shape[:-1]:
            lead *= int(d)
        x2d = audio.reshape(lead, int(orig_shape[-1]))

    alias = bool(donate_input) and out_dtype == in_dtype
    out2d = _scale_2d(x2d, f, out_dtype, block_bytes, sub, vmem_limit, alias)
    return out2d.reshape(orig_shape)


if __name__ == "__main__":
    f = 0.85  # config scalar (the module reads it from opt['AttackLayer']['AmplitudeModify']['f'])
    key = jax.random.PRNGKey(0)
    k0, k1, k2, k3 = jax.random.split(key, 4)

    # Primary small case matching module usage: (batch, samples).
    audio = jax.random.normal(k0, (2, 1024), dtype=jnp.float32)
    out = jax.block_until_ready(amplitude_modify(audio, f))
    assert out.shape == audio.shape and out.dtype == audio.dtype
    assert jnp.allclose(out, audio * f, rtol=1e-6, atol=1e-6)

    # Multi-block path: 4 MiB input -> >=4 grid steps, overlapped in/out DMA.
    audio2 = jax.random.normal(k1, (16, 65536), dtype=jnp.float32)
    out2 = jax.block_until_ready(amplitude_modify(audio2, f))
    assert jnp.allclose(out2, audio2 * f, rtol=1e-6, atol=1e-6)

    # bf16 path (16-row sublane multiple; kernel does f32 math, casts back).
    audio3 = jax.random.normal(k2, (4, 2048), dtype=jnp.float32).astype(jnp.bfloat16)
    out3 = jax.block_until_ready(amplitude_modify(audio3, f))
    expected3 = (audio3.astype(jnp.float32) * f).astype(jnp.bfloat16)
    assert out3.dtype == jnp.bfloat16 and jnp.array_equal(out3, expected3)

    # Ragged length (not a multiple of 128): masked edge tiles, no pad / no slice.
    audio4 = jax.random.normal(k3, (3, 4099), dtype=jnp.float32)
    out4 = jax.block_until_ready(amplitude_modify(audio4, f))
    assert out4.shape == audio4.shape
    assert jnp.allclose(out4, audio4 * f, rtol=1e-6, atol=1e-6)

    print("KERNEL_OK")
</pallas_src>

<mosaic_0001>
module attributes {stable_mosaic.version = 11 : i64} {
  func.func @_amp_modify_kernel(%arg0: i32, %arg1: i32, %arg2: memref<2x1024xf32, #tpu.memory_space<vmem>>, %arg3: memref<2x1024xf32, #tpu.memory_space<vmem>>) attributes {dimension_semantics = [#tpu.dimension_semantics<parallel>, #tpu.dimension_semantics<parallel>], iteration_bounds = array<i64: 1, 1>, scalar_prefetch = 0 : i64, scratch_operands = 0 : i64, tpu.core_type = #tpu.core_type<tc>, window_params = [{transform_indices = @transform_0, window_bounds = array<i64: 2, 1024>}, {transform_indices = @transform_1, window_bounds = array<i64: 2, 1024>}]} {
    %c0 = arith.constant 0 : index
    %c0_0 = arith.constant 0 : index
    %0 = vector.load %arg2[%c0, %c0_0] : memref<2x1024xf32, #tpu.memory_space<vmem>>, vector<2x1024xf32>
    %cst = arith.constant 8.500000e-01 : f32
    %1 = vector.broadcast %cst : f32 to vector<2x1024xf32>
    %2 = arith.mulf %0, %1 : vector<2x1024xf32>
    %c0_1 = arith.constant 0 : index
    %c0_2 = arith.constant 0 : index
    %3 = vector.load %arg3[%c0_1, %c0_2] : memref<2x1024xf32, #tpu.memory_space<vmem>>, vector<2x1024xf32>
    tpu.vector_store %arg3[%c0_1, %c0_2], %2 {strides = array<i32>} : memref<2x1024xf32, #tpu.memory_space<vmem>>, vector<2x1024xf32>,
    return
  }
  func.func @transform_0(%arg0: i32, %arg1: i32) -> (i32, i32) {
    %c0_i32 = arith.constant 0 : i32
    return %arg0, %arg1 : i32, i32
  }
  func.func @transform_1(%arg0: i32, %arg1: i32) -> (i32, i32) {
    %c0_i32 = arith.constant 0 : i32
    return %arg0, %arg1 : i32, i32
  }
}

</mosaic_0001>

<bundles_post_ra>
// kernel: tpu_custom_call.1
= control target key start
LH: loop header
LB: loop body
LE: loop exit
PB: predicated region body
PF: predicated region fallthrough
CT: control target
= control target key end

     0   :  { %6 = vsyncpa [#allocation3], 0  ;;  %s118_s0 = inlined_call_operand.hbm [shape: f32[2,1024], index: 0, kind: input, shape index: {}]   ;;  %s119_s1 = inlined_call_operand.hbm [shape: f32[2,1024], index: 1, kind: output, shape index: {}]  }
   0x1   :  { %7 = vsyncpa [#allocation4], 0  ;;  %s13_s8 = sshll.u32 %s118_s0, 4  ;;  %s100_s9 = smov [#allocation2]   ;;  %s14_s8 = int_to_ptr.hbm [resolvable:$true] %s13_s8 }
   0x2   :  { %s15_s10 = sshll.u32 %s100_s9, 4  ;;  %s16_s10 = int_to_ptr.vmem [resolvable:$true] %s15_s10 }
   0x3   :  { %18 = dma.hbm_to_vmem [thread:$0]  %s14_s8, 256, %s16_s10, [#allocation3]  }
   0x4   :  { %96 = dma.done.wait [#allocation3], 256  }
   0x5   :  { %97 = vsyncadd [#allocation3], 4294967040  ;;  %s101_s11 = smov [#allocation5]   ;;  %s36_s15 = sshll.u32 %s119_s1, 4  ;;  %v23_v0 = vld [vmem:[#allocation2] sm:$0xff]  ;;  %v24_v1 = vld [vmem:[#allocation2 + $0x8] sm:$0xff]  ;;  %s37_s15 = int_to_ptr.hbm [resolvable:$true] %s36_s15 }
   0x6   :  { %s34_s12 = sshll.u32 %s101_s11, 4  ;;  %v25_v2 = vmul.f32 0.85, %v23_v0  ;;  %v26_v3 = vmul.f32 0.85, %v24_v1  ;;  %s35_s12 = int_to_ptr.vmem [resolvable:$true] %s34_s12 }
   0x8   :  { %27 = vst [vmem:[#allocation5] sm:$0xff] %v25_v2 }
   0x9   :  { %28 = vst [vmem:[#allocation5 + $0x8] sm:$0xff] %v26_v3 }
   0xa   :  { %39 = dma.vmem_to_hbm [thread:$0]  %s35_s12, 256, %s37_s15, [#allocation4]  }
   0xb   :  { %98 = dma.done.wait [#allocation4], 256  }
   0xc   :  { %99 = vsyncadd [#allocation4], 4294967040 }
   0xd   :  { %44 = vsyncpa [#allocation3], 1 }
   0xe   :  { %45 = vsyncpa [#allocation4], 1 }

</bundles_post_ra>
